<compile_context>
chip_gen: v7x
topology: tpu7x:2x2x1
jax: 0.10.0
libtpu: 0.0.40
codegen_flags: <defaults>
</compile_context>

<pallas_src>
import functools

import jax
import jax.numpy as jnp
from jax.experimental import pallas as pl
from jax.experimental.pallas import tpu as pltpu


def _round_up(x, m):
    return ((x + m - 1) // m) * m


def _diffloss_partial_kernel(x1_ref, x2_ref, s12_ref, s1_ref, s2_ref, *,
                             true_d, batch, tile_d, steps_per_core,
                             num_cores):
    c = pl.program_id(0)   # core / partial-accumulator index ("parallel")
    k = pl.program_id(1)   # D-step within this core ("arbitrary" reduction)

    @pl.when(k == 0)
    def _():
        s12_ref[...] = jnp.zeros_like(s12_ref)
        s1_ref[...] = jnp.zeros_like(s1_ref)
        s2_ref[...] = jnp.zeros_like(s2_ref)

    def accumulate(x1, x2):
        # Cross-Gram on the MXU, contracting dim 1 of both operands (same
        # pattern as q @ k.T in flash attention; no materialized transpose of
        # the long skinny tile), f32 accumulation into the resident output.
        s12_ref[0] += jax.lax.dot_general(
            x1, x2,
            dimension_numbers=(((1,), (1,)), ((), ())),
            preferred_element_type=jnp.float32)
        # Row sums for the mean-correction term (f32 on the VPU/XLU).
        s1_ref[0] += jnp.sum(x1.astype(jnp.float32), axis=1, keepdims=True)
        s2_ref[0] += jnp.sum(x2.astype(jnp.float32), axis=1, keepdims=True)

    g = c * steps_per_core + k                 # logical global D-step
    full_steps = true_d // tile_d              # blocks with no ragged tail
    total_steps = num_cores * steps_per_core   # logical steps in the grid

    if full_steps > 0:
        if total_steps > full_steps:
            # Fast path: full block, no masking (vast majority of steps).
            @pl.when(g < full_steps)
            def _():
                accumulate(x1_ref[...], x2_ref[...])
        else:
            accumulate(x1_ref[...], x2_ref[...])

    if total_steps > full_steps:
        # Slow path: ragged tail block and/or fully-padded trailing steps on
        # the last core (the input index_map clamps the DMA in-bounds; the
        # logical column range is masked here).
        @pl.when(g >= full_steps)
        def _():
            limit = jnp.clip(true_d - g * tile_d, 0, tile_d)
            lane = jax.lax.broadcasted_iota(jnp.int32, (batch, tile_d), 1)
            valid = lane < limit
            x1v = x1_ref[...]
            x2v = x2_ref[...]
            x1m = jnp.where(valid, x1v, jnp.zeros_like(x1v))
            x2m = jnp.where(valid, x2v, jnp.zeros_like(x2v))
            accumulate(x1m, x2m)


def diff_loss(input1, input2, *, tile_d=None, num_cores=None):
    """Pallas implementation of DiffLoss.forward. Returns a float32 scalar.

    Pass bf16 activations through unchanged (do not upcast to f32 before the
    call): the kernel streams the input dtype and accumulates in f32.
    """
    b = input1.shape[0]
    assert input2.shape[0] == b, "batch sizes must match"

    x1 = input1.reshape(b, -1)
    x2 = input2.reshape(b, -1)
    d = x1.shape[1]
    # PyTorch's x1 @ x2.T requires equal flattened feature dims.
    assert x2.shape[1] == d, "flattened feature dims must match"

    itemsize = max(jnp.dtype(x1.dtype).itemsize, jnp.dtype(x2.dtype).itemsize)
    # Physical layout pads the second-to-last dim to 8 (32-bit) / 16 (16-bit)
    # / 32 (8-bit) sublanes; size VMEM with the padded batch.
    sublane = max(8, 32 // itemsize)
    b_pad = _round_up(b, sublane)
    b_pad_f32 = _round_up(b, 8)

    # Generation-aware VMEM budget (~96 MiB on 128 MiB parts, ~48 MiB on v7x).
    try:
        vmem_cap = int(pltpu.get_tpu_info().vmem_capacity_bytes)
    except Exception:
        vmem_cap = 64 * 1024 * 1024
    vmem_budget = (vmem_cap * 3) // 4

    d_rounded = _round_up(d, 128)

    # Per-core f32 accumulator outputs (padded layout) + slack for compiler
    # internal scratch / output double buffering.
    acc_bytes = (b_pad_f32 * _round_up(b, 128) + 2 * b_pad_f32 * 128) * 4
    slack = 4 * 1024 * 1024

    if tile_d is None:
        # Large blocks amortize the ~0.35 us per-grid-step overhead; keep
        # 2 inputs x 2 pipeline buffers of *padded* blocks within budget.
        target_block_bytes = min(vmem_budget // 5, 16 * 1024 * 1024)
        cap_bytes = max(vmem_budget - acc_bytes - slack, 1 << 20) // 4
        tile_d = min(target_block_bytes, cap_bytes) // (b_pad * itemsize)
    # Multiple of 128 (BlockSpec lane rule), clamped to the rounded feature dim.
    tile_d = max(128, (int(tile_d) // 128) * 128)
    tile_d = min(tile_d, d_rounded)

    n_data_steps = pl.cdiv(d, tile_d)
    if num_cores is None:
        num_cores = 2 if n_data_steps >= 2 else 1
    num_cores = max(1, min(int(num_cores), n_data_steps))
    steps_per_core = pl.cdiv(n_data_steps, num_cores)

    block_bytes = b_pad * tile_d * itemsize
    vmem_limit = 4 * block_bytes + acc_bytes + slack
    vmem_limit = min(max(vmem_limit, 16 * 1024 * 1024), vmem_budget)

    last_block = n_data_steps - 1
    if num_cores * steps_per_core == n_data_steps:
        def in_index_map(c, k):
            return (0, c * steps_per_core + k)
    else:
        # Clamp fully-out-of-range logical steps onto the last in-bounds block
        # (their contribution is masked to zero inside the kernel).
        def in_index_map(c, k):
            return (0, jnp.minimum(c * steps_per_core + k, last_block))

    kernel = functools.partial(
        _diffloss_partial_kernel,
        true_d=d, batch=b, tile_d=tile_d,
        steps_per_core=steps_per_core, num_cores=num_cores)

    s12_p, s1_p, s2_p = pl.pallas_call(
        kernel,
        out_shape=(
            jax.ShapeDtypeStruct((num_cores, b, b), jnp.float32),
            jax.ShapeDtypeStruct((num_cores, b, 1), jnp.float32),
            jax.ShapeDtypeStruct((num_cores, b, 1), jnp.float32),
        ),
        grid_spec=pltpu.PrefetchScalarGridSpec(
            num_scalar_prefetch=0,
            grid=(num_cores, steps_per_core),
            in_specs=[
                pl.BlockSpec((b, tile_d), in_index_map),
                pl.BlockSpec((b, tile_d), in_index_map),
            ],
            out_specs=[
                pl.BlockSpec((1, b, b), lambda c, k: (c, 0, 0)),
                pl.BlockSpec((1, b, 1), lambda c, k: (c, 0, 0)),
                pl.BlockSpec((1, b, 1), lambda c, k: (c, 0, 0)),
            ],
        ),
        compiler_params=pltpu.CompilerParams(
            dimension_semantics=("parallel", "arbitrary"),
            vmem_limit_bytes=int(vmem_limit),
        ),
    )(x1, x2)

    # Tiny (BxB) epilogue in plain JAX: combine per-core partials BEFORE the
    # nonlinearity, apply the mean correction, square, average, scale.
    s12 = jnp.sum(s12_p, axis=0)
    s1 = jnp.sum(s1_p, axis=0)
    s2 = jnp.sum(s2_p, axis=0)
    g = s12 - (s1 * s2.T) * jnp.float32(1.0 / d)
    return jnp.mean(g * g) * jnp.float32(1000.0)


def diff_loss_ref(input1, input2):
    """Pure-JAX reference mirroring the PyTorch module."""
    b = input1.shape[0]
    x1 = input1.reshape(b, -1).astype(jnp.float32)
    x2 = input2.reshape(b, -1).astype(jnp.float32)
    x1 = x1 - x1.mean(axis=1, keepdims=True)
    x2 = x2 - x2.mean(axis=1, keepdims=True)
    g = x1 @ x2.T
    return jnp.mean(g * g) * 1000.0


if __name__ == "__main__":
    key = jax.random.PRNGKey(0)
    k1, k2, k3, k4 = jax.random.split(key, 4)

    # 1) Small NCHW-like inputs: batch=2, channels=4, spatial=16x16 -> D=1024.
    a1 = jax.random.normal(k1, (2, 4, 16, 16), dtype=jnp.float32)
    a2 = jax.random.normal(k2, (2, 4, 16, 16), dtype=jnp.float32)
    out = jax.block_until_ready(diff_loss(a1, a2))
    ref = jax.block_until_ready(diff_loss_ref(a1, a2))
    assert jnp.allclose(out, ref, rtol=1e-4, atol=1e-3), (out, ref)

    # 2) Ragged D (D=300, not a multiple of 128): in-kernel tail masking.
    b1 = jax.random.normal(k3, (2, 3, 10, 10), dtype=jnp.float32)
    b2 = jax.random.normal(k4, (2, 3, 10, 10), dtype=jnp.float32)
    out2 = jax.block_until_ready(diff_loss(b1, b2))
    ref2 = jax.block_until_ready(diff_loss_ref(b1, b2))
    assert jnp.allclose(out2, ref2, rtol=1e-4, atol=1e-3), (out2, ref2)

    # 3) Force the dual-core / multi-step path (2 partials x 4 steps of 128).
    out3 = jax.block_until_ready(diff_loss(a1, a2, tile_d=128, num_cores=2))
    assert jnp.allclose(out3, ref, rtol=1e-4, atol=1e-3), (out3, ref)

    # 4) Dual-core + ragged tail + fully-padded (clamped) trailing step.
    out4 = jax.block_until_ready(diff_loss(b1, b2, tile_d=128, num_cores=2))
    assert jnp.allclose(out4, ref2, rtol=1e-4, atol=1e-3), (out4, ref2)

    # 5) bf16 activations streamed unchanged (f32 accumulation in-kernel).
    c1 = a1.astype(jnp.bfloat16)
    c2 = a2.astype(jnp.bfloat16)
    out5 = jax.block_until_ready(diff_loss(c1, c2))
    ref5 = jax.block_until_ready(diff_loss_ref(c1, c2))
    assert jnp.allclose(out5, ref5, rtol=5e-2, atol=5e-2), (out5, ref5)

    print("KERNEL_OK")
</pallas_src>

<mosaic_0001>
module attributes {stable_mosaic.version = 11 : i64} {
  func.func @_diffloss_partial_kernel(%arg0: i32, %arg1: i32, %arg2: memref<2x1024xf32, #tpu.memory_space<vmem>>, %arg3: memref<2x1024xf32, #tpu.memory_space<vmem>>, %arg4: memref<1x2x2xf32, #tpu.memory_space<vmem>>, %arg5: memref<1x2x1xf32, #tpu.memory_space<vmem>>, %arg6: memref<1x2x1xf32, #tpu.memory_space<vmem>>) attributes {dimension_semantics = [#tpu.dimension_semantics<parallel>, #tpu.dimension_semantics<arbitrary>], iteration_bounds = array<i64: 1, 1>, scalar_prefetch = 0 : i64, scratch_operands = 0 : i64, tpu.core_type = #tpu.core_type<tc>, window_params = [{transform_indices = @transform_0, window_bounds = array<i64: 2, 1024>}, {transform_indices = @transform_1, window_bounds = array<i64: 2, 1024>}, {transform_indices = @transform_2, window_bounds = array<i64: 1, 2, 2>}, {transform_indices = @transform_3, window_bounds = array<i64: 1, 2, 1>}, {transform_indices = @transform_4, window_bounds = array<i64: 1, 2, 1>}]} {
    %c0_i32 = arith.constant 0 : i32
    %0 = arith.cmpi eq, %arg1, %c0_i32 : i32
    %1 = arith.extui %0 : i1 to i32
    %c0_i32_0 = arith.constant 0 : i32
    %2 = arith.cmpi ne, %1, %c0_i32_0 : i32
    scf.if %2 {
      %cst_24 = arith.constant 0.000000e+00 : f32
      %28 = vector.broadcast %cst_24 : f32 to vector<1x2x2xf32>
      %c0_25 = arith.constant 0 : index
      %c0_26 = arith.constant 0 : index
      %c0_27 = arith.constant 0 : index
      %29 = vector.load %arg4[%c0_25, %c0_26, %c0_27] : memref<1x2x2xf32, #tpu.memory_space<vmem>>, vector<1x2x2xf32>
      tpu.vector_store %arg4[%c0_25, %c0_26, %c0_27], %28 {strides = array<i32>} : memref<1x2x2xf32, #tpu.memory_space<vmem>>, vector<1x2x2xf32>,
      %cst_28 = arith.constant 0.000000e+00 : f32
      %30 = vector.broadcast %cst_28 : f32 to vector<1x2x1xf32>
      %c0_29 = arith.constant 0 : index
      %c0_30 = arith.constant 0 : index
      %c0_31 = arith.constant 0 : index
      %31 = vector.load %arg5[%c0_29, %c0_30, %c0_31] : memref<1x2x1xf32, #tpu.memory_space<vmem>>, vector<1x2x1xf32>
      tpu.vector_store %arg5[%c0_29, %c0_30, %c0_31], %30 {strides = array<i32>} : memref<1x2x1xf32, #tpu.memory_space<vmem>>, vector<1x2x1xf32>,
      %cst_32 = arith.constant 0.000000e+00 : f32
      %32 = vector.broadcast %cst_32 : f32 to vector<1x2x1xf32>
      %c0_33 = arith.constant 0 : index
      %c0_34 = arith.constant 0 : index
      %c0_35 = arith.constant 0 : index
      %33 = vector.load %arg6[%c0_33, %c0_34, %c0_35] : memref<1x2x1xf32, #tpu.memory_space<vmem>>, vector<1x2x1xf32>
      tpu.vector_store %arg6[%c0_33, %c0_34, %c0_35], %32 {strides = array<i32>} : memref<1x2x1xf32, #tpu.memory_space<vmem>>, vector<1x2x1xf32>,
    } else {
    }
    %c0 = arith.constant 0 : index
    %c0_1 = arith.constant 0 : index
    %3 = vector.load %arg2[%c0, %c0_1] : memref<2x1024xf32, #tpu.memory_space<vmem>>, vector<2x1024xf32>
    %c0_2 = arith.constant 0 : index
    %c0_3 = arith.constant 0 : index
    %4 = vector.load %arg3[%c0_2, %c0_3] : memref<2x1024xf32, #tpu.memory_space<vmem>>, vector<2x1024xf32>
    %c0_4 = arith.constant 0 : index
    %c0_5 = arith.constant 0 : index
    %c0_6 = arith.constant 0 : index
    %5 = vector.load %arg4[%c0_4, %c0_5, %c0_6] : memref<1x2x2xf32, #tpu.memory_space<vmem>>, vector<1x2x2xf32>
    %6 = vector.shape_cast %5 : vector<1x2x2xf32> to vector<2x2xf32>
    %cst = arith.constant dense<0.000000e+00> : vector<2x2xf32>
    %7 = tpu.matmul %3, %4, %cst {dimension_numbers = #tpu.dot_dimension_numbers<[1], [1], [0], [0], [0, 0, 1, 0], [], []>} : vector<2x1024xf32>, vector<2x1024xf32>, vector<2x2xf32> -> vector<2x2xf32>
    %8 = arith.addf %6, %7 : vector<2x2xf32>
    %c0_7 = arith.constant 0 : index
    %c0_8 = arith.constant 0 : index
    %c0_9 = arith.constant 0 : index
    %9 = vector.load %arg4[%c0_7, %c0_8, %c0_9] : memref<1x2x2xf32, #tpu.memory_space<vmem>>, vector<1x2x2xf32>
    %10 = vector.shape_cast %9 : vector<1x2x2xf32> to vector<2x2xf32>
    %11 = vector.shape_cast %8 : vector<2x2xf32> to vector<1x2x2xf32>
    tpu.vector_store %arg4[%c0_7, %c0_8, %c0_9], %11 {strides = array<i32>} : memref<1x2x2xf32, #tpu.memory_space<vmem>>, vector<1x2x2xf32>,
    %c0_10 = arith.constant 0 : index
    %c0_11 = arith.constant 0 : index
    %c0_12 = arith.constant 0 : index
    %12 = vector.load %arg5[%c0_10, %c0_11, %c0_12] : memref<1x2x1xf32, #tpu.memory_space<vmem>>, vector<1x2x1xf32>
    %13 = vector.shape_cast %12 : vector<1x2x1xf32> to vector<2x1xf32>
    %cst_13 = arith.constant dense<0.000000e+00> : vector<2xf32>
    %14 = vector.multi_reduction <add>, %3, %cst_13 [1] : vector<2x1024xf32> to vector<2xf32>
    %15 = vector.shape_cast %14 : vector<2xf32> to vector<2x1xf32>
    %16 = arith.addf %13, %15 : vector<2x1xf32>
    %c0_14 = arith.constant 0 : index
    %c0_15 = arith.constant 0 : index
    %c0_16 = arith.constant 0 : index
    %17 = vector.load %arg5[%c0_14, %c0_15, %c0_16] : memref<1x2x1xf32, #tpu.memory_space<vmem>>, vector<1x2x1xf32>
    %18 = vector.shape_cast %17 : vector<1x2x1xf32> to vector<2x1xf32>
    %19 = vector.shape_cast %16 : vector<2x1xf32> to vector<1x2x1xf32>
    tpu.vector_store %arg5[%c0_14, %c0_15, %c0_16], %19 {strides = array<i32>} : memref<1x2x1xf32, #tpu.memory_space<vmem>>, vector<1x2x1xf32>,
    %c0_17 = arith.constant 0 : index
    %c0_18 = arith.constant 0 : index
    %c0_19 = arith.constant 0 : index
    %20 = vector.load %arg6[%c0_17, %c0_18, %c0_19] : memref<1x2x1xf32, #tpu.memory_space<vmem>>, vector<1x2x1xf32>
    %21 = vector.shape_cast %20 : vector<1x2x1xf32> to vector<2x1xf32>
    %cst_20 = arith.constant dense<0.000000e+00> : vector<2xf32>
    %22 = vector.multi_reduction <add>, %4, %cst_20 [1] : vector<2x1024xf32> to vector<2xf32>
    %23 = vector.shape_cast %22 : vector<2xf32> to vector<2x1xf32>
    %24 = arith.addf %21, %23 : vector<2x1xf32>
    %c0_21 = arith.constant 0 : index
    %c0_22 = arith.constant 0 : index
    %c0_23 = arith.constant 0 : index
    %25 = vector.load %arg6[%c0_21, %c0_22, %c0_23] : memref<1x2x1xf32, #tpu.memory_space<vmem>>, vector<1x2x1xf32>
    %26 = vector.shape_cast %25 : vector<1x2x1xf32> to vector<2x1xf32>
    %27 = vector.shape_cast %24 : vector<2x1xf32> to vector<1x2x1xf32>
    tpu.vector_store %arg6[%c0_21, %c0_22, %c0_23], %27 {strides = array<i32>} : memref<1x2x1xf32, #tpu.memory_space<vmem>>, vector<1x2x1xf32>,
    return
  }
  func.func @transform_0(%arg0: i32, %arg1: i32) -> (i32, i32) {
    %c1_i32 = arith.constant 1 : i32
    %0 = arith.muli %arg0, %c1_i32 : i32
    %1 = arith.addi %0, %arg1 : i32
    %c0_i32 = arith.constant 0 : i32
    %c0_i32_0 = arith.constant 0 : i32
    return %c0_i32, %1 : i32, i32
  }
  func.func @transform_1(%arg0: i32, %arg1: i32) -> (i32, i32) {
    %c1_i32 = arith.constant 1 : i32
    %0 = arith.muli %arg0, %c1_i32 : i32
    %1 = arith.addi %0, %arg1 : i32
    %c0_i32 = arith.constant 0 : i32
    %c0_i32_0 = arith.constant 0 : i32
    return %c0_i32, %1 : i32, i32
  }
  func.func @transform_2(%arg0: i32, %arg1: i32) -> (i32, i32, i32) {
    %c0_i32 = arith.constant 0 : i32
    %c0_i32_0 = arith.constant 0 : i32
    %c0_i32_1 = arith.constant 0 : i32
    return %arg0, %c0_i32, %c0_i32_0 : i32, i32, i32
  }
  func.func @transform_3(%arg0: i32, %arg1: i32) -> (i32, i32, i32) {
    %c0_i32 = arith.constant 0 : i32
    %c0_i32_0 = arith.constant 0 : i32
    %c0_i32_1 = arith.constant 0 : i32
    return %arg0, %c0_i32, %c0_i32_0 : i32, i32, i32
  }
  func.func @transform_4(%arg0: i32, %arg1: i32) -> (i32, i32, i32) {
    %c0_i32 = arith.constant 0 : i32
    %c0_i32_0 = arith.constant 0 : i32
    %c0_i32_1 = arith.constant 0 : i32
    return %arg0, %c0_i32, %c0_i32_0 : i32, i32, i32
  }
}

</mosaic_0001>

<bundles_post_ra>
// kernel: tpu_custom_call.1
= control target key start
LH: loop header
LB: loop body
LE: loop exit
PB: predicated region body
PF: predicated region fallthrough
CT: control target
= control target key end

     0   :  { %10 = vsyncpa [#allocation3], 0  ;;  %s685_s0 = inlined_call_operand.hbm [shape: f32[2,1024], index: 0, kind: input, shape index: {}]   ;;  %s686_s1 = inlined_call_operand.hbm [shape: f32[2,1024], index: 1, kind: input, shape index: {}]   ;;  %s687_s2 = inlined_call_operand.hbm [shape: f32[1,2,2], index: 2, kind: output, shape index: {0}]   ;;  %s688_s3 = inlined_call_operand.vmem [shape: f32[1,2,1], index: 3, kind: output, shape index: {1}]   ;;  %s689_s4 = inlined_call_operand.vmem [shape: f32[1,2,1], index: 4, kind: output, shape index: {2}]  }
   0x1   :  { %11 = vsyncpa [#allocation6], 0 }
   0x2   :  { %12 = vsyncpa [#allocation4], 0  ;;  %s583_s15 = smov [#allocation2]   ;;  %s584_s17 = smov [#allocation5]  }
   0x3   :  { %s23_s16 = sshll.u32 %s583_s15, 4  ;;  %s37_s18 = sshll.u32 %s584_s17, 4  ;;  %s24_s16 = int_to_ptr.vmem [resolvable:$true] %s23_s16  ;;  %s38_s18 = int_to_ptr.vmem [resolvable:$true] %s37_s18 }
   0x4   :  { %s511_s21 = scalar_lea.hbm %s685_s0, 256 }
   0x5   :  { %p512_p0 = scmp.ne.s32.totalorder %s685_s0, %s511_s21  ;;  %p515_p1 = scmp.lt.u32.totalorder %s511_s21, %s685_s0 }
   0x7   :  { %p517_p2 = pnand %p515_p1, %p512_p0 }
   0x9   :  { %520 = shalt.err (!%p517_p2)
}
   0xa   :  { %s521_s26 = scalar_lea.vmem %s24_s16, 256  ;;  %p526_p4 = scmp.lt.s32.totalorder %s24_s16, %s24_s16 }
   0xb   :  { %p522_p3 = scmp.ne.s32.totalorder %s24_s16, %s521_s26  ;;  %p527_p5 = scmp.lt.s32.totalorder %s521_s26, %s521_s26 }
   0xd   :  { %p528_p6 = por %p527_p5, %p526_p4 }
   0xf   :  { %p529_p7 = pnand %p528_p6, %p522_p3 }
  0x11   :  { %532 = shalt.err (!%p529_p7)
}
  0x12   :  { %26 = dma.hbm_to_vmem [thread:$0]  %s685_s0, 256, %s24_s16, [#allocation3]  }
  0x13   :  { %s533_s5 = scalar_lea.hbm %s686_s1, 256 }
  0x14   :  { %p534_p8 = scmp.ne.s32.totalorder %s686_s1, %s533_s5  ;;  %p537_p9 = scmp.lt.u32.totalorder %s533_s5, %s686_s1 }
  0x16   :  { %p539_p10 = pnand %p537_p9, %p534_p8 }
  0x18   :  { %542 = shalt.err (!%p539_p10)
}
  0x19   :  { %s543_s10 = scalar_lea.vmem %s38_s18, 256  ;;  %p548_p12 = scmp.lt.s32.totalorder %s38_s18, %s38_s18 }
  0x1a   :  { %p544_p11 = scmp.ne.s32.totalorder %s38_s18, %s543_s10  ;;  %p549_p13 = scmp.lt.s32.totalorder %s543_s10, %s543_s10 }
  0x1c   :  { %p550_p0 = por %p549_p13, %p548_p12 }
  0x1e   :  { %p551_p1 = pnand %p550_p0, %p544_p11 }
  0x20   :  { %554 = shalt.err (!%p551_p1)
}
  0x21   :  { %40 = dma.hbm_to_vmem [thread:$0]  %s686_s1, 256, %s38_s18, [#allocation6]  }
  0x22   :  { %577 = dma.done.wait [#allocation3], 256  }
  0x23   :  { %578 = vsyncadd [#allocation3], 4294967040 }
  0x24   :  { %579 = dma.done.wait [#allocation6], 256  }
  0x25   :  { %580 = vsyncadd [#allocation6], 4294967040  ;;  %v71_v0 = vlaneseq  ;;  %v585_v1 = vmov 1983009808   ;;  %v62_v6 = vld [vmem:[#allocation5] sm:$0xff]  ;;  %vm437_vm0 = vcmask 1041408  }
  0x26   :  { %v69_v2 = vunpack.c.l.s4 %v585_v1  ;;  %v63_v7 = vld [vmem:[#allocation5 + $0x8] sm:$0xff]  ;;  %v60_v8 = vld [vmem:[#allocation2] sm:$0xff]  ;;  %v111_v10 = vcombine.high %v62_v6, %v62_v6  ;;  %v61_v13 = vld [vmem:[#allocation2 + $0x8] sm:$0xff]  ;;  %vm57_vm1 = vcmask 1024   ;;  %v586_v60 = vmov 0.0   ;;  %s587_s23 = smov [#allocation7]  }
  0x27   :  { %v72_v3 = vshrl.u32 %v71_v0, 7  ;;  %v67_v14 = vcombine.high %v60_v8, %v60_v8  ;;  %v128_v15 = vcombine.high %v63_v7, %v63_v7  ;;  %v84_v20 = vcombine.high %v61_v13, %v61_v13  ;;  %58 = vst.msk [vmem:[%s688_s3] sm:$0x3] %vm57_vm1, %v586_v60  ;;  %59 = vst.msk [vmem:[%s689_s4] sm:$0x3] %vm57_vm1, %v586_v60  ;;  %s484_s24 = sshll.u32 %s587_s23, 4  ;;  %s485_s24 = int_to_ptr.vmem [resolvable:$true] %s484_s24 }
  0x28   :  { %v70_v4 = vunpack.c.0.s8 %v69_v2  ;;  %vm55_vm2 = vcmask 9216   ;;  %p560_p3 = scmp.lt.s32.totalorder %s485_s24, %s485_s24 }
  0x29   :  { %56 = vst.msk [vmem:[#allocation7] sm:$0x3] %vm55_vm2, %v586_v60 }
  0x2a   :  { %v73_v5 = vsub.s32 %v70_v4, %v72_v3 }
  0x2c   :  { %v118_v9 = vrot.slane %v62_v6, %v73_v5  ;;  %v135_v11 = vrot.slane %v63_v7, %v73_v5  ;;  %v74_v12 = vrot.slane %v60_v8, %v73_v5  ;;  %v91_v16 = vrot.slane %v61_v13, %v73_v5 }
  0x2d   :  { %v125_v19 = vrot.slane %v111_v10, %v73_v5  ;;  %v81_v24 = vrot.slane %v67_v14, %v73_v5  ;;  %v142_v28 = vrot.slane %v128_v15, %v73_v5  ;;  %v98_v39 = vrot.slane %v84_v20, %v73_v5 }
  0x2e   :  { %v126_v17 = vcombine.high %v118_v9, %v118_v9  ;;  %v459_v18 = vsel %vm437_vm0, %v118_v9, 0.0  ;;  %v82_v21 = vcombine.high %v74_v12, %v74_v12  ;;  %v438_v22 = vsel %vm437_vm0, %v74_v12, 0.0  ;;  %v436_v61 = vld [vmem:[%s688_s3] sm:$0x3] }
  0x2f   :  { %v143_v23 = vcombine.high %v135_v11, %v135_v11  ;;  %v127_v26 = vcombine.high %v125_v19, %v125_v19  ;;  %v462_v27 = vsel %vm437_vm0, %v125_v19, 0.0  ;;  %v83_v31 = vcombine.high %v81_v24, %v81_v24  ;;  %v458_v0 = vld [vmem:[%s689_s4] sm:$0x3] }
  0x30   :  { %153 = vmatprep.subr.mxu0 %v126_v17  ;;  %v460_v25 = vsel %vm437_vm0, %v126_v17, 0.0  ;;  %217 = vmatprep.mubr.f32.mxu0 %v82_v21  ;;  %v439_v30 = vsel %vm437_vm0, %v82_v21, 0.0  ;;  %v441_v34 = vsel %vm437_vm0, %v81_v24, 0.0  ;;  %v144_v35 = vcombine.high %v142_v28, %v142_v28 }
  0x31   :  { %v461_v29 = vadd.f32 %v460_v25, %v459_v18  ;;  %154 = vmatpush1.xpose.msra.mxu0 %v118_v9  ;;  %223 = vmatprep.subr.mxu1 %v127_v26  ;;  %v464_v32 = vsel %vm437_vm0, %v127_v26, 0.0  ;;  %v440_v33 = vadd.f32 %v439_v30, %v438_v22  ;;  %v443_v37 = vsel %vm437_vm0, %v83_v31, 0.0 }
  0x32   :  { %293 = vmatprep.subr.mxu0 %v143_v23  ;;  %224 = vmatpush1.xpose.msra.mxu1 %v125_v19  ;;  %v99_v38 = vcombine.high %v91_v16, %v91_v16  ;;  %v466_v40 = vsel %vm437_vm0, %v135_v11, 0.0  ;;  %v100_v43 = vcombine.high %v98_v39, %v98_v39  ;;  %v445_v44 = vsel %vm437_vm0, %v91_v16, 0.0 }
  0x33   :  { %v463_v36 = vadd.f32 %v462_v27, %v461_v29  ;;  %287 = vmatprep.mubr.f32.mxu1 %v83_v31  ;;  %v442_v41 = vadd.f32 %v441_v34, %v440_v33  ;;  %363 = vmatprep.subr.mxu1 %v144_v35  ;;  %v468_v45 = vsel %vm437_vm0, %v143_v23, 0.0  ;;  %v449_v50 = vsel %vm437_vm0, %v98_v39, 0.0 }
  0x34   :  { %218 = vmatmul.mubr.f32.vlgmr.msra.gmra.mrb[0].mxu0 %v74_v12  ;;  %v447_v48 = vsel %vm437_vm0, %v99_v38, 0.0  ;;  %v470_v52 = vsel %vm437_vm0, %v142_v28, 0.0  ;;  %v451_v54 = vsel %vm437_vm0, %v100_v43, 0.0  ;;  %v472_v57 = vsel %vm437_vm0, %v144_v35, 0.0 }
  0x35   :  { %v465_v42 = vadd.f32 %v464_v32, %v463_v36  ;;  %294 = vmatpush1.xpose.msra.mxu0 %v135_v11  ;;  %357 = vmatprep.mubr.f32.mxu0 %v99_v38  ;;  %v444_v46 = vadd.f32 %v443_v37, %v442_v41  ;;  %v64_v11 = vld [vmem:[#allocation7] sm:$0x3] }
  0x36   :  { %288 = vmatmul.mubr.f32.vlgmr.msra.gmra.mrb[0].mxu1 %v81_v24 }
  0x37   :  { %v467_v47 = vadd.f32 %v466_v40, %v465_v42  ;;  %364 = vmatpush1.xpose.msra.mxu1 %v142_v28  ;;  %427 = vmatprep.mubr.f32.mxu1 %v100_v43  ;;  %v446_v49 = vadd.f32 %v445_v44, %v444_v46 }
  0x38   :  { %358 = vmatmul.mubr.f32.vlgmr.msra.gmra.mrb[2].mxu0 %v91_v16 }
  0x39   :  { %v469_v51 = vadd.f32 %v468_v45, %v467_v47  ;;  %v448_v53 = vadd.f32 %v447_v48, %v446_v49 }
  0x3a   :  { %428 = vmatmul.mubr.f32.vlgmr.msra.gmra.mrb[2].mxu1 %v98_v39 }
  0x3b   :  { %v450_v55 = vadd.f32 %v449_v50, %v448_v53  ;;  %v471_v56 = vadd.f32 %v470_v52, %v469_v51 }
  0x3d   :  { %v452_v58 = vadd.f32 %v451_v54, %v450_v55  ;;  %v473_v59 = vadd.f32 %v472_v57, %v471_v56 }
  0x3f   :  { %453 = vadd.xlane.f32.xlu0 %v452_v58 }
  0x43   :  { %474 = vadd.xlane.f32.xlu0 %v473_v59 }
  0xcc   :  { %v454_v62 = vpop.xlane.xlu0 %453 }
  0xcd   :  { %v455_v63 = vadd.f32 %v454_v62, %v436_v61 }
  0xcf   :  { %457 = vst.msk [vmem:[%s688_s3] sm:$0x3] %vm57_vm1, %v455_v63  ;;  %s555_s3 = scalar_lea.vmem %s485_s24, 32 }
  0xd0   :  { %v475_v1 = vpop.xlane.xlu0 %474  ;;  %p556_p2 = scmp.ne.s32.totalorder %s485_s24, %s555_s3  ;;  %p561_p4 = scmp.lt.s32.totalorder %s555_s3, %s555_s3 }
  0xd1   :  { %v476_v2 = vadd.f32 %v475_v1, %v458_v0 }
  0xd2   :  { %p562_p5 = por %p561_p4, %p560_p3 }
  0xd3   :  { %477 = vst.msk [vmem:[%s689_s4] sm:$0x3] %vm57_vm1, %v476_v2 }
  0xd4   :  { %p563_p6 = pnand %p562_p5, %p556_p2 }
 0x107   :  { %v219_v3 = vpop.f32.mrb[0].mxu0 }
 0x108   :  { %v221_v4 = vpop.f32.mrb[1].mxu0 }
 0x109   :  { %v289_v5 = vpop.f32.mrb[0].mxu1 }
 0x10a   :  { %v290_v6 = vadd.f32 %v289_v5, %v219_v3  ;;  %v291_v7 = vpop.f32.mrb[1].mxu1 }
 0x10b   :  { %v359_v8 = vpop.f32.mrb[2].mxu0 }
 0x10c   :  { %v360_v9 = vadd.f32 %v359_v8, %v290_v6  ;;  %v361_v10 = vpop.f32.mrb[3].mxu0 }
 0x10d   :  { %v429_v12 = vpop.f32.mrb[2].mxu1 }
 0x10e   :  { %v430_v13 = vadd.f32 %v429_v12, %v360_v9  ;;  %v431_v14 = vpop.f32.mrb[3].mxu1 }
 0x110   :  { %v433_v15 = vadd.f32 %v430_v13, %v64_v11 }
 0x112   :  { %435 = vst.msk [vmem:[#allocation7] sm:$0x3] %vm55_vm2, %v433_v15 }
 0x113   :  { %566 = shalt.err (!%p563_p6)
}
 0x114   :  { %s567_s26 = scalar_lea.hbm %s687_s2, 32 }
 0x115   :  { %p568_p7 = scmp.ne.s32.totalorder %s687_s2, %s567_s26  ;;  %p571_p8 = scmp.lt.u32.totalorder %s567_s26, %s687_s2 }
 0x117   :  { %p573_p9 = pnand %p571_p8, %p568_p7 }
 0x119   :  { %576 = shalt.err (!%p573_p9)
}
 0x11a   :  { %487 = dma.vmem_to_hbm [thread:$0]  %s485_s24, 32, %s687_s2, [#allocation4]  }
 0x11b   :  { %581 = dma.done.wait [#allocation4], 32  }
 0x11c   :  { %582 = vsyncadd [#allocation4], 4294967264 }
 0x11d   :  { %499 = vsyncpa [#allocation3], 1 }
 0x11e   :  { %500 = vsyncpa [#allocation6], 1 }
 0x11f   :  { %501 = vsyncpa [#allocation4], 1 }

</bundles_post_ra>
